<compile_context>
chip_gen: v6e
topology: v6e:2x2x1
jax: 0.10.0
libtpu: 0.0.40
codegen_flags: <defaults>
</compile_context>

<pallas_src>
import math

import jax
import jax.numpy as jnp
from jax.experimental import pallas as pl
from jax.experimental.pallas import tpu as pltpu


def _mlp_kernel(x_ref, w1_ref, b1_ref, w2_ref, b2_ref, o_ref):
    # x_ref:  [TBp, pack*S]   (pack batch rows per lane row)
    # w1_ref: [pack*S, pack*H] block-diagonal, b1_ref: [1, pack*H]
    # w2_ref: [pack*H, pack*A] block-diagonal, b2_ref: [1, pack*A]
    # o_ref:  [TBp, pack*A]
    h = jnp.dot(x_ref[...], w1_ref[...], preferred_element_type=jnp.float32)
    h = jnp.maximum(h + b1_ref[...], 0.0)                      # bias + ReLU
    out = jnp.dot(h, w2_ref[...], preferred_element_type=jnp.float32)
    o_ref[...] = (out + b2_ref[...]).astype(o_ref.dtype)


def _round_up(x, m):
    return ((x + m - 1) // m) * m


def _cdiv(a, b):
    return -(-a // b)


def pack_params(w1, b1, w2, b2, pack=None):
    """Build tiny block-diagonal packed weights ONCE (~0.8 MiB total).

    w1: [S, H], b1: [H], w2: [H, A], b2: [A]  (stored as [in, out])
    Returns (w1_big [pack*S, pack*H], b1_big [1, pack*H],
             w2_big [pack*H, pack*A], b2_big [1, pack*A]).
    """
    S = w1.shape[0]
    if pack is None:
        pack = max(1, 128 // S)          # fill the 128-lane axis (S=8 -> 16)
    eye = jnp.eye(pack, dtype=w1.dtype)
    w1_big = jnp.kron(eye, w1)           # [pack*S, pack*H] block-diagonal
    w2_big = jnp.kron(eye, w2)           # [pack*H, pack*A] block-diagonal
    b1_big = jnp.tile(b1, pack).reshape(1, -1)
    b2_big = jnp.tile(b2, pack).reshape(1, -1)
    return w1_big, b1_big, w2_big, b2_big


def k_selection_agent_forward(state, packed_params, *, tb=32768):
    """Forward pass.

    state: [B, state_size] f32 (PyTorch layout, features last)
    packed_params: output of pack_params(...)
    tb: batch tile size in ORIGINAL rows (default 32768 -> ~2 MiB I/O / step).
    returns Q-values [B, action_size] f32.
    """
    B, S = state.shape
    w1_big, b1_big, w2_big, b2_big = packed_params
    PS = w1_big.shape[0]
    PH = w1_big.shape[1]
    PA = w2_big.shape[1]
    pack = PS // S
    A = PA // pack

    # Pack `pack` rows per lane row.  Only a (small) pad copy when
    # B % pack != 0; for the common power-of-two batches the reshape is free.
    Bpad = _round_up(B, pack)
    if Bpad != B:
        state = jnp.pad(state, ((0, Bpad - B), (0, 0)))
    Bp = Bpad // pack
    x_packed = state.reshape(Bp, PS)     # contiguous => no data movement

    # Tile selection over the PACKED batch.
    #  * cap at 4096 packed rows (~48 MiB VMEM incl. double buffers + temps)
    #  * keep >= 2 grid steps so the "parallel" axis splits across both
    #    TensorCores on v7x; tiles are sublane-aligned (multiple of 8).
    max_tbp = max(1, min(tb // pack, 4096))
    if Bp <= 8:
        TBp = Bp                                  # single full-extent block
    else:
        half = _round_up(_cdiv(Bp, 2), 8)
        TBp = max(8, min(max_tbp, half))
    grid = (_cdiv(Bp, TBp),)                      # last block may be partial

    const = lambda i: (0, 0)   # weights/biases stay VMEM-resident (no re-DMA)

    out_packed = pl.pallas_call(
        _mlp_kernel,
        out_shape=jax.ShapeDtypeStruct((Bp, PA), jnp.float32),
        grid_spec=pltpu.PrefetchScalarGridSpec(
            num_scalar_prefetch=0,
            grid=grid,
            in_specs=[
                pl.BlockSpec((TBp, PS), lambda i: (i, 0)),    # packed state tile
                pl.BlockSpec((PS, PH), const),                # W1 block-diag
                pl.BlockSpec((1, PH), const),                 # b1 (tiled)
                pl.BlockSpec((PH, PA), const),                # W2 block-diag
                pl.BlockSpec((1, PA), const),                 # b2 (tiled)
            ],
            out_specs=pl.BlockSpec((TBp, PA), lambda i: (i, 0)),
        ),
        compiler_params=pltpu.CompilerParams(
            dimension_semantics=("parallel",),        # megacore split on v7x
            vmem_limit_bytes=48 * 1024 * 1024,        # > v5e 16 MiB default,
        ),                                            # < v7x 64 MiB physical
    )(x_packed, w1_big, b1_big, w2_big, b2_big)

    out = out_packed.reshape(Bpad, A)                 # free contiguous reshape
    return out if Bpad == B else out[:B]


def init_params(key, state_size, min_k=2, max_k=10):
    """Deterministic PyTorch-style (Kaiming-uniform-ish) Linear init."""
    action_size = max_k - min_k + 1
    hidden = 32
    k1, k2, k3, k4 = jax.random.split(key, 4)

    bound1 = 1.0 / math.sqrt(state_size)
    # stored as [in, out] (transposed vs. torch's [out, in])
    w1 = jax.random.uniform(k1, (state_size, hidden), jnp.float32, -bound1, bound1)
    b1 = jax.random.uniform(k2, (hidden,), jnp.float32, -bound1, bound1)

    bound2 = 1.0 / math.sqrt(hidden)
    w2 = jax.random.uniform(k3, (hidden, action_size), jnp.float32, -bound2, bound2)
    b2 = jax.random.uniform(k4, (action_size,), jnp.float32, -bound2, bound2)
    return w1, b1, w2, b2


def reference_forward(state, w1, b1, w2, b2):
    h = jnp.maximum(state @ w1 + b1, 0.0)
    return h @ w2 + b2


if __name__ == "__main__":
    key = jax.random.PRNGKey(0)
    k_params, k_small, k_mid, k_big = jax.random.split(key, 4)

    state_size = 8
    min_k, max_k = 2, 10            # action_size = 9
    action_size = max_k - min_k + 1

    w1, b1, w2, b2 = init_params(k_params, state_size, min_k, max_k)
    packed = pack_params(w1, b1, w2, b2)   # built once, ~0.8 MiB

    # Small, module-sized case: batch = 2 (single tiny block).
    state_small = jax.random.normal(k_small, (2, state_size), jnp.float32)
    q_small = jax.block_until_ready(k_selection_agent_forward(state_small, packed))
    ref_small = reference_forward(state_small, w1, b1, w2, b2)
    assert q_small.shape == (2, action_size)
    assert jnp.allclose(q_small, ref_small, atol=1e-5, rtol=1e-5)

    # B = 1000: exercises pad-to-16 packing, 2 grid steps, partial last block.
    state_mid = jax.random.normal(k_mid, (1000, state_size), jnp.float32)
    q_mid = jax.block_until_ready(k_selection_agent_forward(state_mid, packed))
    ref_mid = reference_forward(state_mid, w1, b1, w2, b2)
    assert q_mid.shape == (1000, action_size)
    assert jnp.allclose(q_mid, ref_mid, atol=1e-4, rtol=1e-4)

    # B = 4096: clean multiple of 16, even 2-step grid (megacore split on v7x).
    state_big = jax.random.normal(k_big, (4096, state_size), jnp.float32)
    q_big = jax.block_until_ready(k_selection_agent_forward(state_big, packed))
    ref_big = reference_forward(state_big, w1, b1, w2, b2)
    assert q_big.shape == (4096, action_size)
    assert jnp.allclose(q_big, ref_big, atol=1e-4, rtol=1e-4)

    # greedy action (choose_action with epsilon=0) — host-side glue, not kernel
    _ = min_k + int(jnp.argmax(q_small[0]))

    print("KERNEL_OK")
</pallas_src>

<mosaic_0001>
module attributes {stable_mosaic.version = 11 : i64} {
  func.func @_mlp_kernel(%arg0: i32, %arg1: memref<1x128xf32, #tpu.memory_space<vmem>>, %arg2: memref<128x512xf32, #tpu.memory_space<vmem>>, %arg3: memref<1x512xf32, #tpu.memory_space<vmem>>, %arg4: memref<512x144xf32, #tpu.memory_space<vmem>>, %arg5: memref<1x144xf32, #tpu.memory_space<vmem>>, %arg6: memref<1x144xf32, #tpu.memory_space<vmem>>) attributes {dimension_semantics = [#tpu.dimension_semantics<parallel>], iteration_bounds = array<i64: 1>, scalar_prefetch = 0 : i64, scratch_operands = 0 : i64, tpu.core_type = #tpu.core_type<tc>, window_params = [{transform_indices = @transform_0, window_bounds = array<i64: 1, 128>}, {pipeline_mode = #tpu.pipeline_mode<synchronous>, transform_indices = @transform_1, window_bounds = array<i64: 128, 512>}, {pipeline_mode = #tpu.pipeline_mode<synchronous>, transform_indices = @transform_2, window_bounds = array<i64: 1, 512>}, {pipeline_mode = #tpu.pipeline_mode<synchronous>, transform_indices = @transform_3, window_bounds = array<i64: 512, 144>}, {pipeline_mode = #tpu.pipeline_mode<synchronous>, transform_indices = @transform_4, window_bounds = array<i64: 1, 144>}, {transform_indices = @transform_5, window_bounds = array<i64: 1, 144>}]} {
    %c0 = arith.constant 0 : index
    %c0_0 = arith.constant 0 : index
    %0 = vector.load %arg1[%c0, %c0_0] : memref<1x128xf32, #tpu.memory_space<vmem>>, vector<1x128xf32>
    %c0_1 = arith.constant 0 : index
    %c0_2 = arith.constant 0 : index
    %1 = vector.load %arg2[%c0_1, %c0_2] : memref<128x512xf32, #tpu.memory_space<vmem>>, vector<128x512xf32>
    %cst = arith.constant dense<0.000000e+00> : vector<1x512xf32>
    %2 = tpu.matmul %0, %1, %cst {dimension_numbers = #tpu.dot_dimension_numbers<[1], [0], [0], [1], [0, 0, 1, 1], [], []>} : vector<1x128xf32>, vector<128x512xf32>, vector<1x512xf32> -> vector<1x512xf32>
    %c0_3 = arith.constant 0 : index
    %c0_4 = arith.constant 0 : index
    %3 = vector.load %arg3[%c0_3, %c0_4] : memref<1x512xf32, #tpu.memory_space<vmem>>, vector<1x512xf32>
    %4 = arith.addf %2, %3 : vector<1x512xf32>
    %cst_5 = arith.constant 0.000000e+00 : f32
    %5 = vector.broadcast %cst_5 : f32 to vector<1x512xf32>
    %6 = arith.maximumf %4, %5 : vector<1x512xf32>
    %c0_6 = arith.constant 0 : index
    %c0_7 = arith.constant 0 : index
    %7 = vector.load %arg4[%c0_6, %c0_7] : memref<512x144xf32, #tpu.memory_space<vmem>>, vector<512x144xf32>
    %cst_8 = arith.constant dense<0.000000e+00> : vector<1x144xf32>
    %8 = tpu.matmul %6, %7, %cst_8 {dimension_numbers = #tpu.dot_dimension_numbers<[1], [0], [0], [1], [0, 0, 1, 1], [], []>} : vector<1x512xf32>, vector<512x144xf32>, vector<1x144xf32> -> vector<1x144xf32>
    %c0_9 = arith.constant 0 : index
    %c0_10 = arith.constant 0 : index
    %9 = vector.load %arg5[%c0_9, %c0_10] : memref<1x144xf32, #tpu.memory_space<vmem>>, vector<1x144xf32>
    %10 = arith.addf %8, %9 : vector<1x144xf32>
    %c0_11 = arith.constant 0 : index
    %c0_12 = arith.constant 0 : index
    %11 = vector.load %arg6[%c0_11, %c0_12] : memref<1x144xf32, #tpu.memory_space<vmem>>, vector<1x144xf32>
    tpu.vector_store %arg6[%c0_11, %c0_12], %10 {strides = array<i32>} : memref<1x144xf32, #tpu.memory_space<vmem>>, vector<1x144xf32>,
    return
  }
  func.func @transform_0(%arg0: i32) -> (i32, i32) {
    %c0_i32 = arith.constant 0 : i32
    %c0_i32_0 = arith.constant 0 : i32
    return %arg0, %c0_i32 : i32, i32
  }
  func.func @transform_1(%arg0: i32) -> (i32, i32) {
    %c0_i32 = arith.constant 0 : i32
    %c0_i32_0 = arith.constant 0 : i32
    %c0_i32_1 = arith.constant 0 : i32
    return %c0_i32, %c0_i32_0 : i32, i32
  }
  func.func @transform_2(%arg0: i32) -> (i32, i32) {
    %c0_i32 = arith.constant 0 : i32
    %c0_i32_0 = arith.constant 0 : i32
    %c0_i32_1 = arith.constant 0 : i32
    return %c0_i32, %c0_i32_0 : i32, i32
  }
  func.func @transform_3(%arg0: i32) -> (i32, i32) {
    %c0_i32 = arith.constant 0 : i32
    %c0_i32_0 = arith.constant 0 : i32
    %c0_i32_1 = arith.constant 0 : i32
    return %c0_i32, %c0_i32_0 : i32, i32
  }
  func.func @transform_4(%arg0: i32) -> (i32, i32) {
    %c0_i32 = arith.constant 0 : i32
    %c0_i32_0 = arith.constant 0 : i32
    %c0_i32_1 = arith.constant 0 : i32
    return %c0_i32, %c0_i32_0 : i32, i32
  }
  func.func @transform_5(%arg0: i32) -> (i32, i32) {
    %c0_i32 = arith.constant 0 : i32
    %c0_i32_0 = arith.constant 0 : i32
    return %arg0, %c0_i32 : i32, i32
  }
}

</mosaic_0001>

<bundles_post_ra>
// kernel: tpu_custom_call.1
= control target key start
LH: loop header
LB: loop body
LE: loop exit
PB: predicated region body
PF: predicated region fallthrough
CT: control target
= control target key end

     0   :  { %s1219_s0 = inlined_call_operand.vmem [shape: f32[1,128], index: 0, kind: input, shape index: {}]   ;;  %s1220_s1 = inlined_call_operand.vmem [shape: f32[128,512], index: 1, kind: input, shape index: {}]   ;;  %s1221_s2 = inlined_call_operand.vmem [shape: f32[1,512], index: 2, kind: input, shape index: {}]   ;;  %s1222_s3 = inlined_call_operand.vmem [shape: f32[512,144], index: 3, kind: input, shape index: {}]   ;;  %s1223_s4 = inlined_call_operand.vmem [shape: f32[1,144], index: 4, kind: input, shape index: {}]   ;;  %s1224_s5 = inlined_call_operand.hbm [shape: f32[1,144], index: 5, kind: output, shape index: {}]  }
   0x1   :  { %v83_v0 = vld [vmem:[%s1220_s1 + $0x1e8] sm:$0xff]  ;;  %v85_v1 = vld [vmem:[%s1220_s1 + $0x1f8] sm:$0xff]  ;;  %v82_v2 = vld [vmem:[%s1220_s1 + $0x1e0] sm:$0xff] }
   0x2   :  { %108 = vmatprep.subr.mxu0 %v83_v0  ;;  %179 = vmatprep.subr.mxu1 %v85_v1  ;;  %v84_v3 = vld [vmem:[%s1220_s1 + $0x1f0] sm:$0xff]  ;;  %v79_v4 = vld [vmem:[%s1220_s1 + $0x1c8] sm:$0xff]  ;;  %v81_v5 = vld [vmem:[%s1220_s1 + $0x1d8] sm:$0xff]  ;;  %v598_v1 = vmov 0.0  }
   0x3   :  { %109 = vmatpush1.msra.mxu0 %v82_v2  ;;  %180 = vmatpush1.msra.mxu1 %v84_v3  ;;  %v78_v6 = vld [vmem:[%s1220_s1 + $0x1c0] sm:$0xff]  ;;  %v80_v7 = vld [vmem:[%s1220_s1 + $0x1d0] sm:$0xff]  ;;  %v75_v8 = vld [vmem:[%s1220_s1 + $0x1a8] sm:$0xff] }
   0x4   :  { %110 = vmatprep.subr.mxu0 %v79_v4  ;;  %181 = vmatprep.subr.mxu1 %v81_v5  ;;  %v77_v9 = vld [vmem:[%s1220_s1 + $0x1b8] sm:$0xff]  ;;  %v74_v10 = vld [vmem:[%s1220_s1 + $0x1a0] sm:$0xff]  ;;  %v76_v11 = vld [vmem:[%s1220_s1 + $0x1b0] sm:$0xff] }
   0x5   :  { %111 = vmatpush1.msra.mxu0 %v78_v6  ;;  %182 = vmatpush1.msra.mxu1 %v80_v7  ;;  %v71_v12 = vld [vmem:[%s1220_s1 + $0x188] sm:$0xff]  ;;  %v73_v13 = vld [vmem:[%s1220_s1 + $0x198] sm:$0xff]  ;;  %v70_v14 = vld [vmem:[%s1220_s1 + $0x180] sm:$0xff] }
   0x6   :  { %112 = vmatprep.subr.mxu0 %v75_v8  ;;  %183 = vmatprep.subr.mxu1 %v77_v9  ;;  %v72_v15 = vld [vmem:[%s1220_s1 + $0x190] sm:$0xff]  ;;  %v67_v16 = vld [vmem:[%s1220_s1 + $0x168] sm:$0xff]  ;;  %v69_v17 = vld [vmem:[%s1220_s1 + $0x178] sm:$0xff] }
   0x7   :  { %113 = vmatpush1.msra.mxu0 %v74_v10  ;;  %184 = vmatpush1.msra.mxu1 %v76_v11  ;;  %v66_v18 = vld [vmem:[%s1220_s1 + $0x160] sm:$0xff]  ;;  %v68_v19 = vld [vmem:[%s1220_s1 + $0x170] sm:$0xff]  ;;  %v63_v20 = vld [vmem:[%s1220_s1 + $0x148] sm:$0xff] }
   0x8   :  { %114 = vmatprep.subr.mxu0 %v71_v12  ;;  %185 = vmatprep.subr.mxu1 %v73_v13  ;;  %v65_v21 = vld [vmem:[%s1220_s1 + $0x158] sm:$0xff]  ;;  %v62_v22 = vld [vmem:[%s1220_s1 + $0x140] sm:$0xff]  ;;  %v64_v23 = vld [vmem:[%s1220_s1 + $0x150] sm:$0xff] }
   0x9   :  { %115 = vmatpush1.msra.mxu0 %v70_v14  ;;  %186 = vmatpush1.msra.mxu1 %v72_v15  ;;  %v59_v24 = vld [vmem:[%s1220_s1 + $0x128] sm:$0xff]  ;;  %v61_v25 = vld [vmem:[%s1220_s1 + $0x138] sm:$0xff]  ;;  %v58_v26 = vld [vmem:[%s1220_s1 + $0x120] sm:$0xff] }
   0xa   :  { %116 = vmatprep.subr.mxu0 %v67_v16  ;;  %187 = vmatprep.subr.mxu1 %v69_v17  ;;  %v60_v27 = vld [vmem:[%s1220_s1 + $0x130] sm:$0xff]  ;;  %v55_v28 = vld [vmem:[%s1220_s1 + $0x108] sm:$0xff]  ;;  %v57_v29 = vld [vmem:[%s1220_s1 + $0x118] sm:$0xff] }
   0xb   :  { %117 = vmatpush1.msra.mxu0 %v66_v18  ;;  %188 = vmatpush1.msra.mxu1 %v68_v19  ;;  %v54_v30 = vld [vmem:[%s1220_s1 + $0x100] sm:$0xff]  ;;  %v56_v31 = vld [vmem:[%s1220_s1 + $0x110] sm:$0xff]  ;;  %v51_v32 = vld [vmem:[%s1220_s1 + $0xe8] sm:$0xff] }
   0xc   :  { %118 = vmatprep.subr.mxu0 %v63_v20  ;;  %189 = vmatprep.subr.mxu1 %v65_v21  ;;  %v53_v33 = vld [vmem:[%s1220_s1 + $0xf8] sm:$0xff]  ;;  %v50_v34 = vld [vmem:[%s1220_s1 + $0xe0] sm:$0xff]  ;;  %v52_v35 = vld [vmem:[%s1220_s1 + $0xf0] sm:$0xff] }
   0xd   :  { %119 = vmatpush1.msra.mxu0 %v62_v22  ;;  %190 = vmatpush1.msra.mxu1 %v64_v23  ;;  %v47_v36 = vld [vmem:[%s1220_s1 + $0xc8] sm:$0xff]  ;;  %v49_v37 = vld [vmem:[%s1220_s1 + $0xd8] sm:$0xff]  ;;  %v46_v38 = vld [vmem:[%s1220_s1 + $0xc0] sm:$0xff] }
   0xe   :  { %120 = vmatprep.subr.mxu0 %v59_v24  ;;  %191 = vmatprep.subr.mxu1 %v61_v25  ;;  %v48_v39 = vld [vmem:[%s1220_s1 + $0xd0] sm:$0xff]  ;;  %v43_v40 = vld [vmem:[%s1220_s1 + $0xa8] sm:$0xff]  ;;  %v45_v41 = vld [vmem:[%s1220_s1 + $0xb8] sm:$0xff] }
   0xf   :  { %121 = vmatpush1.msra.mxu0 %v58_v26  ;;  %192 = vmatpush1.msra.mxu1 %v60_v27  ;;  %v42_v42 = vld [vmem:[%s1220_s1 + $0xa0] sm:$0xff]  ;;  %v44_v43 = vld [vmem:[%s1220_s1 + $0xb0] sm:$0xff]  ;;  %v39_v44 = vld [vmem:[%s1220_s1 + $0x88] sm:$0xff] }
  0x10   :  { %122 = vmatprep.subr.mxu0 %v55_v28  ;;  %193 = vmatprep.subr.mxu1 %v57_v29  ;;  %v41_v45 = vld [vmem:[%s1220_s1 + $0x98] sm:$0xff]  ;;  %v38_v46 = vld [vmem:[%s1220_s1 + $0x80] sm:$0xff]  ;;  %v40_v47 = vld [vmem:[%s1220_s1 + $0x90] sm:$0xff] }
  0x11   :  { %123 = vmatpush1.msra.mxu0 %v54_v30  ;;  %194 = vmatpush1.msra.mxu1 %v56_v31  ;;  %v35_v48 = vld [vmem:[%s1220_s1 + $0x68] sm:$0xff]  ;;  %v37_v49 = vld [vmem:[%s1220_s1 + $0x78] sm:$0xff]  ;;  %v34_v50 = vld [vmem:[%s1220_s1 + $0x60] sm:$0xff] }
  0x12   :  { %124 = vmatprep.subr.mxu0 %v51_v32  ;;  %195 = vmatprep.subr.mxu1 %v53_v33  ;;  %v36_v51 = vld [vmem:[%s1220_s1 + $0x70] sm:$0xff]  ;;  %v31_v52 = vld [vmem:[%s1220_s1 + $0x48] sm:$0xff]  ;;  %v33_v53 = vld [vmem:[%s1220_s1 + $0x58] sm:$0xff] }
  0x13   :  { %125 = vmatpush1.msra.mxu0 %v50_v34  ;;  %196 = vmatpush1.msra.mxu1 %v52_v35  ;;  %v30_v54 = vld [vmem:[%s1220_s1 + $0x40] sm:$0xff]  ;;  %v32_v55 = vld [vmem:[%s1220_s1 + $0x50] sm:$0xff]  ;;  %v27_v56 = vld [vmem:[%s1220_s1 + $0x28] sm:$0xff] }
  0x14   :  { %126 = vmatprep.subr.mxu0 %v47_v36  ;;  %197 = vmatprep.subr.mxu1 %v49_v37  ;;  %v29_v57 = vld [vmem:[%s1220_s1 + $0x38] sm:$0xff]  ;;  %v26_v58 = vld [vmem:[%s1220_s1 + $0x20] sm:$0xff]  ;;  %v28_v59 = vld [vmem:[%s1220_s1 + $0x30] sm:$0xff] }
  0x15   :  { %127 = vmatpush1.msra.mxu0 %v46_v38  ;;  %198 = vmatpush1.msra.mxu1 %v48_v39  ;;  %v23_v60 = vld [vmem:[%s1220_s1 + $0x8] sm:$0xff]  ;;  %v25_v61 = vld [vmem:[%s1220_s1 + $0x18] sm:$0xff]  ;;  %v22_v62 = vld [vmem:[%s1220_s1] sm:$0xff] }
  0x16   :  { %128 = vmatprep.subr.mxu0 %v43_v40  ;;  %199 = vmatprep.subr.mxu1 %v45_v41  ;;  %v24_v63 = vld [vmem:[%s1220_s1 + $0x10] sm:$0xff]  ;;  %v21_v0 = vld [vmem:[%s1219_s0] sm:$0x1]  ;;  %v285_v2 = vld [vmem:[%s1222_s3 + $0xf8] sm:$0xff] }
  0x17   :  { %129 = vmatpush1.msra.mxu0 %v42_v42  ;;  %200 = vmatpush1.msra.mxu1 %v44_v43  ;;  %v349_v3 = vld [vmem:[%s1222_s3 + $0x2f8] sm:$0xff]  ;;  %v284_v4 = vld [vmem:[%s1222_s3 + $0xf0] sm:$0xff]  ;;  %v283_v6 = vld [vmem:[%s1222_s3 + $0xe8] sm:$0xff] }
  0x18   :  { %130 = vmatprep.subr.mxu0 %v39_v44  ;;  %201 = vmatprep.subr.mxu1 %v41_v45  ;;  %v348_v5 = vld [vmem:[%s1222_s3 + $0x2f0] sm:$0xff]  ;;  %v347_v7 = vld [vmem:[%s1222_s3 + $0x2e8] sm:$0xff]  ;;  %v282_v8 = vld [vmem:[%s1222_s3 + $0xe0] sm:$0xff] }
  0x19   :  { %131 = vmatpush1.msra.mxu0 %v38_v46  ;;  %202 = vmatpush1.msra.mxu1 %v40_v47  ;;  %v346_v9 = vld [vmem:[%s1222_s3 + $0x2e0] sm:$0xff]  ;;  %v281_v10 = vld [vmem:[%s1222_s3 + $0xd8] sm:$0xff]  ;;  %v280_v12 = vld [vmem:[%s1222_s3 + $0xd0] sm:$0xff] }
  0x1a   :  { %132 = vmatprep.subr.mxu0 %v35_v48  ;;  %203 = vmatprep.subr.mxu1 %v37_v49  ;;  %v345_v11 = vld [vmem:[%s1222_s3 + $0x2d8] sm:$0xff]  ;;  %v344_v13 = vld [vmem:[%s1222_s3 + $0x2d0] sm:$0xff]  ;;  %v279_v14 = vld [vmem:[%s1222_s3 + $0xc8] sm:$0xff] }
  0x1b   :  { %133 = vmatpush1.msra.mxu0 %v34_v50  ;;  %204 = vmatpush1.msra.mxu1 %v36_v51  ;;  %v343_v15 = vld [vmem:[%s1222_s3 + $0x2c8] sm:$0xff]  ;;  %v278_v16 = vld [vmem:[%s1222_s3 + $0xc0] sm:$0xff]  ;;  %v277_v18 = vld [vmem:[%s1222_s3 + $0xb8] sm:$0xff] }
  0x1c   :  { %134 = vmatprep.subr.mxu0 %v31_v52  ;;  %205 = vmatprep.subr.mxu1 %v33_v53  ;;  %v342_v17 = vld [vmem:[%s1222_s3 + $0x2c0] sm:$0xff]  ;;  %v341_v19 = vld [vmem:[%s1222_s3 + $0x2b8] sm:$0xff]  ;;  %v276_v20 = vld [vmem:[%s1222_s3 + $0xb0] sm:$0xff] }
  0x1d   :  { %135 = vmatpush1.msra.mxu0 %v30_v54  ;;  %206 = vmatpush1.msra.mxu1 %v32_v55  ;;  %v340_v21 = vld [vmem:[%s1222_s3 + $0x2b0] sm:$0xff]  ;;  %v275_v22 = vld [vmem:[%s1222_s3 + $0xa8] sm:$0xff]  ;;  %v274_v24 = vld [vmem:[%s1222_s3 + $0xa0] sm:$0xff] }
  0x1e   :  { %136 = vmatprep.subr.mxu0 %v27_v56  ;;  %207 = vmatprep.subr.mxu1 %v29_v57  ;;  %v339_v23 = vld [vmem:[%s1222_s3 + $0x2a8] sm:$0xff]  ;;  %v338_v25 = vld [vmem:[%s1222_s3 + $0x2a0] sm:$0xff]  ;;  %v273_v26 = vld [vmem:[%s1222_s3 + $0x98] sm:$0xff] }
  0x1f   :  { %137 = vmatpush1.msra.mxu0 %v26_v58  ;;  %208 = vmatpush1.msra.mxu1 %v28_v59  ;;  %v337_v27 = vld [vmem:[%s1222_s3 + $0x298] sm:$0xff]  ;;  %v272_v28 = vld [vmem:[%s1222_s3 + $0x90] sm:$0xff]  ;;  %v271_v30 = vld [vmem:[%s1222_s3 + $0x88] sm:$0xff] }
  0x20   :  { %138 = vmatprep.subr.mxu0 %v23_v60  ;;  %209 = vmatprep.subr.mxu1 %v25_v61  ;;  %v336_v29 = vld [vmem:[%s1222_s3 + $0x290] sm:$0xff]  ;;  %v335_v31 = vld [vmem:[%s1222_s3 + $0x288] sm:$0xff]  ;;  %v270_v32 = vld [vmem:[%s1222_s3 + $0x80] sm:$0xff] }
  0x21   :  { %139 = vmatpush1.msra.mxu0 %v22_v62  ;;  %172 = vmatprep.mubr.f32.mxu0 %v598_v1  ;;  %v334_v33 = vld [vmem:[%s1222_s3 + $0x280] sm:$0xff]  ;;  %v269_v34 = vld [vmem:[%s1222_s3 + $0x78] sm:$0xff]  ;;  %v268_v36 = vld [vmem:[%s1222_s3 + $0x70] sm:$0xff] }
  0x22   :  { %210 = vmatpush1.msra.mxu1 %v24_v63  ;;  %243 = vmatprep.mubr.f32.mxu1 %v598_v1  ;;  %v333_v35 = vld [vmem:[%s1222_s3 + $0x278] sm:$0xff]  ;;  %v332_v37 = vld [vmem:[%s1222_s3 + $0x270] sm:$0xff]  ;;  %v267_v38 = vld [vmem:[%s1222_s3 + $0x68] sm:$0xff] }
  0x23   :  { %173 = vmatmul.mubr.f32.vlgmr.msra.gmra.mxu0 %v21_v0  ;;  %244 = vmatmul.mubr.f32.vlgmr.msra.gmra.mxu1 %v21_v0  ;;  %v331_v39 = vld [vmem:[%s1222_s3 + $0x268] sm:$0xff]  ;;  %v266_v40 = vld [vmem:[%s1222_s3 + $0x60] sm:$0xff]  ;;  %v265_v42 = vld [vmem:[%s1222_s3 + $0x58] sm:$0xff] }
  0x24   :  { %394 = vmatprep.subr.mxu0 %v285_v2  ;;  %465 = vmatprep.subr.mxu1 %v349_v3  ;;  %v330_v41 = vld [vmem:[%s1222_s3 + $0x260] sm:$0xff]  ;;  %v329_v43 = vld [vmem:[%s1222_s3 + $0x258] sm:$0xff]  ;;  %v264_v44 = vld [vmem:[%s1222_s3 + $0x50] sm:$0xff] }
  0x25   :  { %395 = vmatpush1.msra.mxu0 %v284_v4  ;;  %466 = vmatpush1.msra.mxu1 %v348_v5  ;;  %v328_v45 = vld [vmem:[%s1222_s3 + $0x250] sm:$0xff]  ;;  %v263_v46 = vld [vmem:[%s1222_s3 + $0x48] sm:$0xff]  ;;  %v262_v48 = vld [vmem:[%s1222_s3 + $0x40] sm:$0xff] }
  0x26   :  { %396 = vmatprep.subr.mxu0 %v283_v6  ;;  %467 = vmatprep.subr.mxu1 %v347_v7  ;;  %v327_v47 = vld [vmem:[%s1222_s3 + $0x248] sm:$0xff]  ;;  %v326_v49 = vld [vmem:[%s1222_s3 + $0x240] sm:$0xff]  ;;  %v261_v50 = vld [vmem:[%s1222_s3 + $0x38] sm:$0xff] }
  0x27   :  { %397 = vmatpush1.msra.mxu0 %v282_v8  ;;  %468 = vmatpush1.msra.mxu1 %v346_v9  ;;  %v325_v51 = vld [vmem:[%s1222_s3 + $0x238] sm:$0xff]  ;;  %v260_v52 = vld [vmem:[%s1222_s3 + $0x30] sm:$0xff]  ;;  %v259_v54 = vld [vmem:[%s1222_s3 + $0x28] sm:$0xff] }
  0x28   :  { %398 = vmatprep.subr.mxu0 %v281_v10  ;;  %469 = vmatprep.subr.mxu1 %v345_v11  ;;  %v324_v53 = vld [vmem:[%s1222_s3 + $0x230] sm:$0xff]  ;;  %v323_v55 = vld [vmem:[%s1222_s3 + $0x228] sm:$0xff]  ;;  %v258_v56 = vld [vmem:[%s1222_s3 + $0x20] sm:$0xff] }
  0x29   :  { %399 = vmatpush1.msra.mxu0 %v280_v12  ;;  %470 = vmatpush1.msra.mxu1 %v344_v13  ;;  %v322_v57 = vld [vmem:[%s1222_s3 + $0x220] sm:$0xff] }
  0x2a   :  { %400 = vmatprep.subr.mxu0 %v279_v14  ;;  %471 = vmatprep.subr.mxu1 %v343_v15 }
  0x2b   :  { %401 = vmatpush1.msra.mxu0 %v278_v16  ;;  %472 = vmatpush1.msra.mxu1 %v342_v17 }
  0x2c   :  { %402 = vmatprep.subr.mxu0 %v277_v18  ;;  %473 = vmatprep.subr.mxu1 %v341_v19 }
  0x2d   :  { %403 = vmatpush1.msra.mxu0 %v276_v20  ;;  %474 = vmatpush1.msra.mxu1 %v340_v21 }
  0x2e   :  { %404 = vmatprep.subr.mxu0 %v275_v22  ;;  %475 = vmatprep.subr.mxu1 %v339_v23 }
  0x2f   :  { %405 = vmatpush1.msra.mxu0 %v274_v24  ;;  %476 = vmatpush1.msra.mxu1 %v338_v25 }
  0x30   :  { %406 = vmatprep.subr.mxu0 %v273_v26  ;;  %477 = vmatprep.subr.mxu1 %v337_v27 }
  0x31   :  { %407 = vmatpush1.msra.mxu0 %v272_v28  ;;  %478 = vmatpush1.msra.mxu1 %v336_v29 }
  0x32   :  { %408 = vmatprep.subr.mxu0 %v271_v30  ;;  %479 = vmatprep.subr.mxu1 %v335_v31 }
  0x33   :  { %409 = vmatpush1.msra.mxu0 %v270_v32  ;;  %480 = vmatpush1.msra.mxu1 %v334_v33 }
  0x34   :  { %410 = vmatprep.subr.mxu0 %v269_v34  ;;  %481 = vmatprep.subr.mxu1 %v333_v35 }
  0x35   :  { %411 = vmatpush1.msra.mxu0 %v268_v36  ;;  %482 = vmatpush1.msra.mxu1 %v332_v37 }
  0x36   :  { %412 = vmatprep.subr.mxu0 %v267_v38  ;;  %483 = vmatprep.subr.mxu1 %v331_v39 }
  0x37   :  { %413 = vmatpush1.msra.mxu0 %v266_v40  ;;  %484 = vmatpush1.msra.mxu1 %v330_v41 }
  0x38   :  { %414 = vmatprep.subr.mxu0 %v265_v42  ;;  %485 = vmatprep.subr.mxu1 %v329_v43 }
  0x39   :  { %415 = vmatpush1.msra.mxu0 %v264_v44  ;;  %486 = vmatpush1.msra.mxu1 %v328_v45 }
  0x3a   :  { %416 = vmatprep.subr.mxu0 %v263_v46  ;;  %487 = vmatprep.subr.mxu1 %v327_v47 }
  0x3b   :  { %417 = vmatpush1.msra.mxu0 %v262_v48  ;;  %488 = vmatpush1.msra.mxu1 %v326_v49 }
  0x3c   :  { %418 = vmatprep.subr.mxu0 %v261_v50  ;;  %489 = vmatprep.subr.mxu1 %v325_v51 }
  0x3d   :  { %10 = vsyncpa [#allocation3], 0  ;;  %419 = vmatpush1.msra.mxu0 %v260_v52  ;;  %490 = vmatpush1.msra.mxu1 %v324_v53  ;;  %v257_v58 = vld [vmem:[%s1222_s3 + $0x18] sm:$0xff]  ;;  %v256_v60 = vld [vmem:[%s1222_s3 + $0x10] sm:$0xff]  ;;  %s600_s11 = smov [#allocation2]  }
  0x3e   :  { %v321_v59 = vld [vmem:[%s1222_s3 + $0x218] sm:$0xff]  ;;  %420 = vmatprep.subr.mxu0 %v259_v54  ;;  %491 = vmatprep.subr.mxu1 %v323_v55  ;;  %v320_v61 = vld [vmem:[%s1222_s3 + $0x210] sm:$0xff]  ;;  %v255_v62 = vld [vmem:[%s1222_s3 + $0x8] sm:$0xff]  ;;  %s565_s12 = sshll.u32 %s600_s11, 4  ;;  %s566_s12 = int_to_ptr.vmem [resolvable:$true] %s565_s12 }
  0x3f   :  { %421 = vmatpush1.msra.mxu0 %v258_v56  ;;  %492 = vmatpush1.msra.mxu1 %v322_v57  ;;  %v319_v63 = vld [vmem:[%s1222_s3 + $0x208] sm:$0xff]  ;;  %v254_v0 = vld [vmem:[%s1222_s3] sm:$0xff]  ;;  %v317_v2 = vld [vmem:[%s1222_s3 + $0x1f8] sm:$0xff]  ;;  %p581_p1 = scmp.lt.s32.totalorder %s566_s12, %s566_s12 }
  0x40   :  { %422 = vmatprep.subr.mxu0 %v257_v58  ;;  %493 = vmatprep.subr.mxu1 %v321_v59  ;;  %v318_v1 = vld [vmem:[%s1222_s3 + $0x200] sm:$0xff]  ;;  %v381_v3 = vld [vmem:[%s1222_s3 + $0x3f8] sm:$0xff]  ;;  %v316_v4 = vld [vmem:[%s1222_s3 + $0x1f0] sm:$0xff] }
  0x41   :  { %423 = vmatpush1.msra.mxu0 %v256_v60  ;;  %494 = vmatpush1.msra.mxu1 %v320_v61  ;;  %v380_v5 = vld [vmem:[%s1222_s3 + $0x3f0] sm:$0xff]  ;;  %v315_v6 = vld [vmem:[%s1222_s3 + $0x1e8] sm:$0xff]  ;;  %v314_v8 = vld [vmem:[%s1222_s3 + $0x1e0] sm:$0xff] }
  0x42   :  { %424 = vmatprep.subr.mxu0 %v255_v62  ;;  %495 = vmatprep.subr.mxu1 %v319_v63  ;;  %v379_v7 = vld [vmem:[%s1222_s3 + $0x3e8] sm:$0xff]  ;;  %v378_v9 = vld [vmem:[%s1222_s3 + $0x3e0] sm:$0xff]  ;;  %v313_v10 = vld [vmem:[%s1222_s3 + $0x1d8] sm:$0xff] }
  0x43   :  { %425 = vmatpush1.msra.mxu0 %v254_v0  ;;  %496 = vmatpush1.msra.mxu1 %v318_v1  ;;  %v377_v11 = vld [vmem:[%s1222_s3 + $0x3d8] sm:$0xff]  ;;  %v312_v12 = vld [vmem:[%s1222_s3 + $0x1d0] sm:$0xff]  ;;  %v311_v14 = vld [vmem:[%s1222_s3 + $0x1c8] sm:$0xff] }
  0x44   :  { %426 = vmatprep.subr.mxu0 %v317_v2  ;;  %497 = vmatprep.subr.mxu1 %v381_v3  ;;  %v376_v13 = vld [vmem:[%s1222_s3 + $0x3d0] sm:$0xff]  ;;  %v375_v15 = vld [vmem:[%s1222_s3 + $0x3c8] sm:$0xff]  ;;  %v310_v16 = vld [vmem:[%s1222_s3 + $0x1c0] sm:$0xff]  ;;  %v88_v2 = vlaneseq }
  0x45   :  { %427 = vmatpush2.msra.mxu0 %v316_v4  ;;  %498 = vmatpush2.msra.mxu1 %v380_v5  ;;  %v374_v17 = vld [vmem:[%s1222_s3 + $0x3c0] sm:$0xff]  ;;  %v309_v18 = vld [vmem:[%s1222_s3 + $0x1b8] sm:$0xff]  ;;  %v308_v20 = vld [vmem:[%s1222_s3 + $0x1b0] sm:$0xff] }
  0x46   :  { %428 = vmatprep.subr.mxu0 %v315_v6  ;;  %499 = vmatprep.subr.mxu1 %v379_v7  ;;  %v373_v19 = vld [vmem:[%s1222_s3 + $0x3b8] sm:$0xff]  ;;  %v372_v21 = vld [vmem:[%s1222_s3 + $0x3b0] sm:$0xff]  ;;  %v307_v22 = vld [vmem:[%s1222_s3 + $0x1a8] sm:$0xff]  ;;  %v89_v3 = vshrl.u32 %v88_v2, 7  ;;  %vm556_vm0 = vcmp.lt.s32.totalorder %v88_v2, 144 }
  0x47   :  { %429 = vmatpush2.msra.mxu0 %v314_v8  ;;  %500 = vmatpush2.msra.mxu1 %v378_v9  ;;  %v371_v23 = vld [vmem:[%s1222_s3 + $0x3a8] sm:$0xff]  ;;  %v306_v24 = vld [vmem:[%s1222_s3 + $0x1a0] sm:$0xff]  ;;  %v305_v26 = vld [vmem:[%s1222_s3 + $0x198] sm:$0xff] }
  0x48   :  { %430 = vmatprep.subr.mxu0 %v313_v10  ;;  %501 = vmatprep.subr.mxu1 %v377_v11  ;;  %v370_v25 = vld [vmem:[%s1222_s3 + $0x3a0] sm:$0xff]  ;;  %v369_v27 = vld [vmem:[%s1222_s3 + $0x398] sm:$0xff]  ;;  %v304_v28 = vld [vmem:[%s1222_s3 + $0x190] sm:$0xff]  ;;  %v98_v4 = vsub.s32 2, %v89_v3  ;;  %v90_v5 = vsub.s32 0, %v89_v3  ;;  %v94_v7 = vsub.s32 1, %v89_v3 }
  0x49   :  { %431 = vmatpush2.msra.mxu0 %v312_v12  ;;  %502 = vmatpush2.msra.mxu1 %v376_v13  ;;  %v368_v29 = vld [vmem:[%s1222_s3 + $0x390] sm:$0xff]  ;;  %v303_v30 = vld [vmem:[%s1222_s3 + $0x188] sm:$0xff]  ;;  %v302_v32 = vld [vmem:[%s1222_s3 + $0x180] sm:$0xff]  ;;  %v102_v8 = vsub.s32 3, %v89_v3 }
  0x4a   :  { %432 = vmatprep.subr.mxu0 %v311_v14  ;;  %503 = vmatprep.subr.mxu1 %v375_v15  ;;  %v367_v31 = vld [vmem:[%s1222_s3 + $0x388] sm:$0xff]  ;;  %v366_v33 = vld [vmem:[%s1222_s3 + $0x380] sm:$0xff]  ;;  %v301_v34 = vld [vmem:[%s1222_s3 + $0x178] sm:$0xff] }
  0x4b   :  { %433 = vmatpush2.msra.mxu0 %v310_v16  ;;  %504 = vmatpush2.msra.mxu1 %v374_v17  ;;  %v365_v35 = vld [vmem:[%s1222_s3 + $0x378] sm:$0xff]  ;;  %v300_v36 = vld [vmem:[%s1222_s3 + $0x170] sm:$0xff]  ;;  %v299_v38 = vld [vmem:[%s1222_s3 + $0x168] sm:$0xff] }
  0x4c   :  { %434 = vmatprep.subr.mxu0 %v309_v18  ;;  %505 = vmatprep.subr.mxu1 %v373_v19  ;;  %v364_v37 = vld [vmem:[%s1222_s3 + $0x370] sm:$0xff]  ;;  %v363_v39 = vld [vmem:[%s1222_s3 + $0x368] sm:$0xff]  ;;  %v298_v40 = vld [vmem:[%s1222_s3 + $0x160] sm:$0xff] }
  0x4d   :  { %435 = vmatpush2.msra.mxu0 %v308_v20  ;;  %506 = vmatpush2.msra.mxu1 %v372_v21  ;;  %v362_v41 = vld [vmem:[%s1222_s3 + $0x360] sm:$0xff]  ;;  %v297_v42 = vld [vmem:[%s1222_s3 + $0x158] sm:$0xff]  ;;  %v296_v44 = vld [vmem:[%s1222_s3 + $0x150] sm:$0xff] }
  0x4e   :  { %436 = vmatprep.subr.mxu0 %v307_v22  ;;  %507 = vmatprep.subr.mxu1 %v371_v23  ;;  %v361_v43 = vld [vmem:[%s1222_s3 + $0x358] sm:$0xff]  ;;  %v360_v45 = vld [vmem:[%s1222_s3 + $0x350] sm:$0xff]  ;;  %v295_v46 = vld [vmem:[%s1222_s3 + $0x148] sm:$0xff] }
  0x4f   :  { %437 = vmatpush2.msra.mxu0 %v306_v24  ;;  %508 = vmatpush2.msra.mxu1 %v370_v25  ;;  %v359_v47 = vld [vmem:[%s1222_s3 + $0x348] sm:$0xff]  ;;  %v294_v48 = vld [vmem:[%s1222_s3 + $0x140] sm:$0xff]  ;;  %v293_v50 = vld [vmem:[%s1222_s3 + $0x138] sm:$0xff] }
  0x50   :  { %438 = vmatprep.subr.mxu0 %v305_v26  ;;  %509 = vmatprep.subr.mxu1 %v369_v27  ;;  %v358_v49 = vld [vmem:[%s1222_s3 + $0x340] sm:$0xff]  ;;  %v357_v51 = vld [vmem:[%s1222_s3 + $0x338] sm:$0xff]  ;;  %v292_v52 = vld [vmem:[%s1222_s3 + $0x130] sm:$0xff]  ;;  %v599_v27 = vmov 1966171168  }
  0x51   :  { %439 = vmatpush2.msra.mxu0 %v304_v28  ;;  %510 = vmatpush2.msra.mxu1 %v368_v29  ;;  %v356_v53 = vld [vmem:[%s1222_s3 + $0x330] sm:$0xff]  ;;  %v291_v54 = vld [vmem:[%s1222_s3 + $0x128] sm:$0xff]  ;;  %v290_v56 = vld [vmem:[%s1222_s3 + $0x120] sm:$0xff]  ;;  %v540_v28 = vunpack.c.l.s4 %v599_v27 }
  0x52   :  { %440 = vmatprep.subr.mxu0 %v303_v30  ;;  %511 = vmatprep.subr.mxu1 %v367_v31  ;;  %v355_v55 = vld [vmem:[%s1222_s3 + $0x328] sm:$0xff]  ;;  %v354_v57 = vld [vmem:[%s1222_s3 + $0x320] sm:$0xff]  ;;  %v289_v58 = vld [vmem:[%s1222_s3 + $0x118] sm:$0xff] }
  0x53   :  { %441 = vmatpush2.msra.mxu0 %v302_v32  ;;  %512 = vmatpush2.msra.mxu1 %v366_v33  ;;  %v353_v59 = vld [vmem:[%s1222_s3 + $0x318] sm:$0xff]  ;;  %v288_v60 = vld [vmem:[%s1222_s3 + $0x110] sm:$0xff]  ;;  %v287_v62 = vld [vmem:[%s1222_s3 + $0x108] sm:$0xff]  ;;  %v541_v33 = vunpack.c.0.s8 %v540_v28 }
  0x54   :  { %442 = vmatprep.subr.mxu0 %v301_v34  ;;  %513 = vmatprep.subr.mxu1 %v365_v35  ;;  %v352_v61 = vld [vmem:[%s1222_s3 + $0x310] sm:$0xff]  ;;  %v351_v63 = vld [vmem:[%s1222_s3 + $0x308] sm:$0xff]  ;;  %v286_v0 = vld [vmem:[%s1222_s3 + $0x100] sm:$0xff] }
  0x55   :  { %443 = vmatpush2.msra.mxu0 %v300_v36  ;;  %514 = vmatpush2.msra.mxu1 %v364_v37  ;;  %v350_v1 = vld [vmem:[%s1222_s3 + $0x300] sm:$0xff] }
  0x56   :  { %444 = vmatprep.subr.mxu0 %v299_v38  ;;  %515 = vmatprep.subr.mxu1 %v363_v39  ;;  %v86_v6 = vld [vmem:[%s1221_s2] sm:$0xf]  ;;  %v544_v39 = vsub.s32 %v541_v33, %v89_v3 }
  0x57   :  { %445 = vmatpush2.msra.mxu0 %v298_v40  ;;  %516 = vmatpush2.msra.mxu1 %v362_v41  ;;  %v99_v9 = vrot.slane %v86_v6, %v98_v4  ;;  %v91_v10 = vrot.slane %v86_v6, %v90_v5  ;;  %v95_v11 = vrot.slane %v86_v6, %v94_v7  ;;  %v382_v25 = vld [vmem:[%s1223_s4] sm:$0x3]  ;;  %s576_s4 = scalar_lea.vmem %s566_s12, 32 }
  0x58   :  { %446 = vmatprep.subr.mxu0 %v297_v42  ;;  %517 = vmatprep.subr.mxu1 %v361_v43  ;;  %v103_v12 = vrot.slane %v86_v6, %v102_v8  ;;  %v387_v26 = vrot.slane %v382_v25, %v90_v5  ;;  %v391_v29 = vrot.slane %v382_v25, %v94_v7  ;;  %p577_p0 = scmp.ne.s32.totalorder %s566_s12, %s576_s4  ;;  %p582_p2 = scmp.lt.s32.totalorder %s576_s4, %s576_s4 }
  0x59   :  { %447 = vmatpush2.msra.mxu0 %v296_v44  ;;  %518 = vmatpush2.msra.mxu1 %v360_v45 }
  0x5a   :  { %448 = vmatprep.subr.mxu0 %v295_v46  ;;  %519 = vmatprep.subr.mxu1 %v359_v47  ;;  %p583_p3 = por %p582_p2, %p581_p1 }
  0x5b   :  { %449 = vmatpush2.msra.mxu0 %v294_v48  ;;  %520 = vmatpush2.msra.mxu1 %v358_v49 }
  0x5c   :  { %450 = vmatprep.subr.mxu0 %v293_v50  ;;  %521 = vmatprep.subr.mxu1 %v357_v51  ;;  %p584_p4 = pnand %p583_p3, %p577_p0 }
  0x5d   :  { %451 = vmatpush2.msra.mxu0 %v292_v52  ;;  %522 = vmatpush2.msra.mxu1 %v356_v53 }
  0x5e   :  { %452 = vmatprep.subr.mxu0 %v291_v54  ;;  %523 = vmatprep.subr.mxu1 %v355_v55 }
  0x5f   :  { %453 = vmatpush2.msra.mxu0 %v290_v56  ;;  %524 = vmatpush2.msra.mxu1 %v354_v57 }
  0x60   :  { %454 = vmatprep.subr.mxu0 %v289_v58  ;;  %525 = vmatprep.subr.mxu1 %v353_v59 }
  0x61   :  { %455 = vmatpush2.msra.mxu0 %v288_v60  ;;  %526 = vmatpush2.msra.mxu1 %v352_v61 }
  0x62   :  { %456 = vmatprep.subr.mxu0 %v287_v62  ;;  %527 = vmatprep.subr.mxu1 %v351_v63 }
  0x63   :  { %457 = vmatpush2.msra.mxu0 %v286_v0  ;;  %528 = vmatpush2.msra.mxu1 %v350_v1 }
  0xe3   :  { %v174_v13 = vpop.f32.mrf.mxu0  ;;  %v245_v14 = vpop.f32.mrf.mxu1 }
  0xe4   :  { %v246_v15 = vadd.f32 %v245_v14, %v99_v9  ;;  %v175_v16 = vadd.f32 %v174_v13, %v91_v10 }
  0xe5   :  { %v176_v17 = vpop.f32.mrf.mxu0  ;;  %v247_v18 = vpop.f32.mrf.mxu1 }
  0xe6   :  { %v177_v19 = vadd.f32 %v176_v17, %v95_v11  ;;  %v248_v20 = vadd.f32 %v247_v18, %v103_v12  ;;  %v252_v21 = vmax.f32 %v246_v15, 0.0  ;;  %v250_v24 = vmax.f32 %v175_v16, 0.0 }
  0xe8   :  { %v251_v22 = vmax.f32 %v177_v19, 0.0  ;;  %v253_v23 = vmax.f32 %v248_v20, 0.0 }
  0xea   :  { %458 = vmatprep.mubr.f32.mxu0 %v251_v22  ;;  %529 = vmatprep.mubr.f32.mxu1 %v253_v23 }
  0xeb   :  { %459 = vmatmul.mubr.f32.vlgmr.msra.gmra.mxu0 %v250_v24  ;;  %530 = vmatmul.mubr.f32.vlgmr.msra.gmra.mxu1 %v252_v21 }
 0x1ab   :  { %v460_v30 = vpop.f32.mrf.mxu0  ;;  %v531_v31 = vpop.f32.mrf.mxu1 }
 0x1ac   :  { %v461_v32 = vadd.f32 %v460_v30, %v387_v26 }
 0x1ad   :  { %v462_v34 = vpop.f32.mrf.mxu0  ;;  %v533_v36 = vpop.f32.mrf.mxu1 }
 0x1ae   :  { %v463_v35 = vadd.f32 %v462_v34, %v391_v29  ;;  %v532_v37 = vadd.f32 %v531_v31, %v461_v32 }
 0x1b0   :  { %v534_v38 = vadd.f32 %v533_v36, %v463_v35 }
 0x1b2   :  { %v538_v40 = vcombine.low %v532_v37, %v534_v38 }
 0x1b4   :  { %v545_v41 = vrot.slane %v538_v40, %v544_v39 }
 0x1b6   :  { %v552_v42 = vrot.slane %v545_v41, %v544_v39 }
 0x1b8   :  { %558 = vst.msk [vmem:[#allocation2] sm:$0x3] %vm556_vm0, %v552_v42 }
 0x1b9   :  { %587 = shalt.err (!%p584_p4)
}
 0x1ba   :  { %568 = dma.vmem_to_hbm [thread:$0]  %s566_s12, 32, %s1224_s5, [#allocation3]  }
 0x1bb   :  { %596 = dma.done.wait [#allocation3], 32  }
 0x1bc   :  { %597 = vsyncadd [#allocation3], 4294967264 }
 0x1bd   :  { %572 = vsyncpa [#allocation3], 1 }

</bundles_post_ra>
